<compile_context>
chip_gen: v5e
topology: v5e:2x2
jax: 0.10.0
libtpu: 0.0.40
codegen_flags: <defaults>
</compile_context>

<pallas_src>
import functools

import jax
import jax.numpy as jnp
from jax.experimental import pallas as pl
from jax.experimental.pallas import tpu as pltpu

_LANE = 128
_SUBLANE = 8
_TARGET_OUT_BYTES = 4 * 1024 * 1024    # per-grid-step output block target
_VMEM_LIMIT_BYTES = 32 * 1024 * 1024   # >= scoped default on every generation


def _sigma_act(x):
    # TODO(synk): `functions.sigma_act` is a custom autograd op whose source is
    # not shipped with the module.  We use the smooth strictly-positive
    # activation elu(x)+1 (== x+1 for x>0, exp(x) for x<=0; value 1 at the
    # zero init of rm), matching its role of mapping rm -> 1/r^2 > 0.
    return jnp.where(x > 0, x + 1.0, jnp.exp(x))


def _pow_spec(d, exp):
    """d**exp with the exponent specialized at trace time (d >= 0 assumed)."""
    if exp == 0.5:
        return jnp.sqrt(d)                     # sqrt(0) == 0, no guard needed
    if exp == 1.0:
        return d
    if exp == 1.5:
        return d * jnp.sqrt(d)
    if exp == 2.0:
        return d * d
    if exp == 3.0:
        return d * d * d
    # General path (3 EUP ops): x**p = exp(p*log x); x==0 -> 0 (valid for p>0,
    # matching torch.pow on the reference path).
    safe = jnp.maximum(d, 1e-37)
    return jnp.where(d > 0, jnp.exp(exp * jnp.log(safe)), 0.0)


def _mykf_kernel(rmvp_ref, d_ref, o_ref, *, exp, nf):
    """One (nf, TS, 128) tile of the kernel-function table C.

    rmvp_ref : SMEM (nf,) f32 = (sigma_act(rm) / rmax**2) ** exp (precomputed)
    d_ref    : VMEM (TS, 128) tile of the (squared-)distance slab
    o_ref    : VMEM (nf, TS, 128) output tile
    """
    d = d_ref[...]
    # TODO(synk): `functions.xp1expm` is a custom autograd op; its name reads
    # "(x+1) * exp(-x)" with exponent `exp`, i.e. the Matern-style correlation
    # C = (1 + x**p) * exp(-(x**p)).  We use (rm*d)**p = rm**p * d**p so the
    # single per-element power is hoisted out of the per-function loop.
    dp = _pow_spec(d, exp)
    for f in range(nf):                        # static unroll; nf is tiny
        xe = rmvp_ref[f] * dp                  # SMEM scalar splat: no XLU work
        o_ref[f] = (1.0 + xe) * jnp.exp(-xe)


def mykf_forward(d, rm, exp, rmax=1.0):
    """Pallas equivalent of MyKF(nfunc, rmax).forward(d, exp).

    `exp` must be a static Python float (as in the PyTorch call sites).
    """
    nf = rm.shape[0]
    exp = float(exp)
    d_shape = d.shape
    D = int(d.size)

    dflat = d.reshape(-1).astype(jnp.float32)
    rows = pl.cdiv(D, _LANE)
    Dp = rows * _LANE
    if Dp != D:
        # Ragged tail only; lane-aligned D (the common (...,16,16) case) skips
        # this pad and the matching output slice entirely.
        dflat = jnp.pad(dflat, (0, Dp - D))
    d2 = dflat.reshape(rows, _LANE)

    # getrm()**exp on nf elements (trivial, done once in the wrapper) so the
    # kernel is a pure scalar*vector + exp per function.
    rmv = _sigma_act(rm.reshape(nf).astype(jnp.float32)) / (float(rmax) ** 2)
    rmvp = jnp.power(rmv, jnp.float32(exp)).astype(jnp.float32)

    # Row-tile: one block unless a step writes >= _TARGET_OUT_BYTES of output,
    # which is what it takes to amortize the ~0.35 us/step pipeline cost (and
    # to give each v7x TensorCore a worthwhile slice).  Double-buffered VMEM
    # footprint = 2 * (1 + nf) * ts * 128 * 4 B <= ~16 MiB, under the explicit
    # 32 MiB limit on every generation.
    per_row_out_bytes = nf * _LANE * 4
    target_rows = max(
        _SUBLANE,
        (_TARGET_OUT_BYTES // per_row_out_bytes) // _SUBLANE * _SUBLANE)
    ts = rows if rows <= target_rows else target_rows
    grid = (pl.cdiv(rows, ts),)

    out = pl.pallas_call(
        functools.partial(_mykf_kernel, exp=exp, nf=nf),
        out_shape=jax.ShapeDtypeStruct((nf, rows, _LANE), jnp.float32),
        grid=grid,
        in_specs=[
            # (nf,) scalars, resident in SMEM for the whole grid.
            pl.BlockSpec(memory_space=pltpu.MemorySpace.SMEM),
            pl.BlockSpec((ts, _LANE), lambda i: (i, 0)),     # d row-tile
        ],
        out_specs=pl.BlockSpec((nf, ts, _LANE), lambda i: (0, i, 0)),
        compiler_params=pltpu.CompilerParams(
            dimension_semantics=("parallel",),
            vmem_limit_bytes=_VMEM_LIMIT_BYTES),
        cost_estimate=pl.CostEstimate(
            flops=3 * nf * Dp,
            transcendentals=(nf + 1) * Dp,
            bytes_accessed=(1 + nf) * Dp * 4),
    )(rmvp, d2)

    out = out.reshape(nf, Dp)
    if Dp != D:
        # TODO(synk): this slice re-materializes the output through HBM on the
        # ragged-D path; consumers that can work on the lane-padded (nf, Dp)
        # slab should take `out` directly.
        out = out[:, :D]
    return out.reshape((nf,) + d_shape)


def mykf_reference(d, rm, exp, rmax=1.0):
    """Pure-JAX reference mirroring the PyTorch forward (same op guesses)."""
    rmv = jnp.where(rm > 0, rm + 1.0, jnp.exp(rm)) / (float(rmax) ** 2)
    x = d.reshape(1, -1).astype(jnp.float32) * rmv
    xe = jnp.power(x, jnp.float32(exp))
    C = (1.0 + xe) * jnp.exp(-xe)
    return C.reshape(C.shape[:-1] + d.shape)


if __name__ == "__main__":
    key = jax.random.PRNGKey(0)
    k_d, k_rm = jax.random.split(key)

    nfunc = 4
    rmax = 1.0
    exp = 0.5

    # d: squared distances, shape (2, 4, 16, 16) -> D = 2048
    # (16 rows x 128 lanes; fits in a single lane-dense grid step).
    d = jax.random.uniform(k_d, (2, 4, 16, 16), dtype=jnp.float32,
                           minval=0.0, maxval=4.0)
    # rm parameter: shape (nfunc, 1) as in __init__ (zeros there); small random
    # deterministic values so each of the nfunc kernels differs.
    rm = 0.5 * jax.random.normal(k_rm, (nfunc, 1), dtype=jnp.float32)

    out = mykf_forward(d, rm, exp, rmax=rmax)
    out = jax.block_until_ready(out)

    ref = mykf_reference(d, rm, exp, rmax=rmax)
    assert out.shape == (nfunc,) + d.shape, (out.shape, d.shape)
    assert jnp.allclose(out, ref, rtol=1e-5, atol=1e-5), \
        float(jnp.max(jnp.abs(out - ref)))

    print("KERNEL_OK")
</pallas_src>

<mosaic_0001>
module attributes {stable_mosaic.version = 11 : i64} {
  func.func @_mykf_kernel(%arg0: i32, %arg1: memref<4xf32, #tpu.memory_space<smem>>, %arg2: memref<16x128xf32, #tpu.memory_space<vmem>>, %arg3: memref<4x16x128xf32, #tpu.memory_space<vmem>>) attributes {dimension_semantics = [#tpu.dimension_semantics<parallel>], iteration_bounds = array<i64: 1>, scalar_prefetch = 0 : i64, scratch_operands = 0 : i64, tpu.core_type = #tpu.core_type<tc>, window_params = [{transform_indices = @transform_0, window_bounds = array<i64: 4>}, {transform_indices = @transform_1, window_bounds = array<i64: 16, 128>}, {transform_indices = @transform_2, window_bounds = array<i64: 4, 16, 128>}]} {
    %c0 = arith.constant 0 : index
    %c0_0 = arith.constant 0 : index
    %0 = vector.load %arg2[%c0, %c0_0] : memref<16x128xf32, #tpu.memory_space<vmem>>, vector<16x128xf32>
    %1 = math.sqrt %0 : vector<16x128xf32>
    %c0_1 = arith.constant 0 : index
    %2 = memref.load %arg1[%c0_1] : memref<4xf32, #tpu.memory_space<smem>>
    %3 = vector.broadcast %2 : f32 to vector<16x128xf32>
    %4 = arith.mulf %3, %1 : vector<16x128xf32>
    %cst = arith.constant 1.000000e+00 : f32
    %5 = vector.broadcast %cst : f32 to vector<16x128xf32>
    %6 = arith.addf %5, %4 : vector<16x128xf32>
    %cst_2 = arith.constant 0.000000e+00 : f32
    %7 = vector.broadcast %cst_2 : f32 to vector<16x128xf32>
    %8 = arith.subf %7, %4 : vector<16x128xf32>
    %9 = math.exp %8 : vector<16x128xf32>
    %10 = arith.mulf %6, %9 : vector<16x128xf32>
    %c0_3 = arith.constant 0 : index
    %c0_4 = arith.constant 0 : index
    %c0_5 = arith.constant 0 : index
    %11 = vector.load %arg3[%c0_3, %c0_4, %c0_5] : memref<4x16x128xf32, #tpu.memory_space<vmem>>, vector<1x16x128xf32>
    %12 = vector.shape_cast %11 : vector<1x16x128xf32> to vector<16x128xf32>
    %13 = vector.shape_cast %10 : vector<16x128xf32> to vector<1x16x128xf32>
    tpu.vector_store %arg3[%c0_3, %c0_4, %c0_5], %13 {strides = array<i32>} : memref<4x16x128xf32, #tpu.memory_space<vmem>>, vector<1x16x128xf32>,
    %c1 = arith.constant 1 : index
    %14 = memref.load %arg1[%c1] : memref<4xf32, #tpu.memory_space<smem>>
    %15 = vector.broadcast %14 : f32 to vector<16x128xf32>
    %16 = arith.mulf %15, %1 : vector<16x128xf32>
    %cst_6 = arith.constant 1.000000e+00 : f32
    %17 = vector.broadcast %cst_6 : f32 to vector<16x128xf32>
    %18 = arith.addf %17, %16 : vector<16x128xf32>
    %cst_7 = arith.constant 0.000000e+00 : f32
    %19 = vector.broadcast %cst_7 : f32 to vector<16x128xf32>
    %20 = arith.subf %19, %16 : vector<16x128xf32>
    %21 = math.exp %20 : vector<16x128xf32>
    %22 = arith.mulf %18, %21 : vector<16x128xf32>
    %c1_8 = arith.constant 1 : index
    %c0_9 = arith.constant 0 : index
    %c0_10 = arith.constant 0 : index
    %23 = vector.load %arg3[%c1_8, %c0_9, %c0_10] : memref<4x16x128xf32, #tpu.memory_space<vmem>>, vector<1x16x128xf32>
    %24 = vector.shape_cast %23 : vector<1x16x128xf32> to vector<16x128xf32>
    %25 = vector.shape_cast %22 : vector<16x128xf32> to vector<1x16x128xf32>
    tpu.vector_store %arg3[%c1_8, %c0_9, %c0_10], %25 {strides = array<i32>} : memref<4x16x128xf32, #tpu.memory_space<vmem>>, vector<1x16x128xf32>,
    %c2 = arith.constant 2 : index
    %26 = memref.load %arg1[%c2] : memref<4xf32, #tpu.memory_space<smem>>
    %27 = vector.broadcast %26 : f32 to vector<16x128xf32>
    %28 = arith.mulf %27, %1 : vector<16x128xf32>
    %cst_11 = arith.constant 1.000000e+00 : f32
    %29 = vector.broadcast %cst_11 : f32 to vector<16x128xf32>
    %30 = arith.addf %29, %28 : vector<16x128xf32>
    %cst_12 = arith.constant 0.000000e+00 : f32
    %31 = vector.broadcast %cst_12 : f32 to vector<16x128xf32>
    %32 = arith.subf %31, %28 : vector<16x128xf32>
    %33 = math.exp %32 : vector<16x128xf32>
    %34 = arith.mulf %30, %33 : vector<16x128xf32>
    %c2_13 = arith.constant 2 : index
    %c0_14 = arith.constant 0 : index
    %c0_15 = arith.constant 0 : index
    %35 = vector.load %arg3[%c2_13, %c0_14, %c0_15] : memref<4x16x128xf32, #tpu.memory_space<vmem>>, vector<1x16x128xf32>
    %36 = vector.shape_cast %35 : vector<1x16x128xf32> to vector<16x128xf32>
    %37 = vector.shape_cast %34 : vector<16x128xf32> to vector<1x16x128xf32>
    tpu.vector_store %arg3[%c2_13, %c0_14, %c0_15], %37 {strides = array<i32>} : memref<4x16x128xf32, #tpu.memory_space<vmem>>, vector<1x16x128xf32>,
    %c3 = arith.constant 3 : index
    %38 = memref.load %arg1[%c3] : memref<4xf32, #tpu.memory_space<smem>>
    %39 = vector.broadcast %38 : f32 to vector<16x128xf32>
    %40 = arith.mulf %39, %1 : vector<16x128xf32>
    %cst_16 = arith.constant 1.000000e+00 : f32
    %41 = vector.broadcast %cst_16 : f32 to vector<16x128xf32>
    %42 = arith.addf %41, %40 : vector<16x128xf32>
    %cst_17 = arith.constant 0.000000e+00 : f32
    %43 = vector.broadcast %cst_17 : f32 to vector<16x128xf32>
    %44 = arith.subf %43, %40 : vector<16x128xf32>
    %45 = math.exp %44 : vector<16x128xf32>
    %46 = arith.mulf %42, %45 : vector<16x128xf32>
    %c3_18 = arith.constant 3 : index
    %c0_19 = arith.constant 0 : index
    %c0_20 = arith.constant 0 : index
    %47 = vector.load %arg3[%c3_18, %c0_19, %c0_20] : memref<4x16x128xf32, #tpu.memory_space<vmem>>, vector<1x16x128xf32>
    %48 = vector.shape_cast %47 : vector<1x16x128xf32> to vector<16x128xf32>
    %49 = vector.shape_cast %46 : vector<16x128xf32> to vector<1x16x128xf32>
    tpu.vector_store %arg3[%c3_18, %c0_19, %c0_20], %49 {strides = array<i32>} : memref<4x16x128xf32, #tpu.memory_space<vmem>>, vector<1x16x128xf32>,
    return
  }
  func.func @transform_0(%arg0: i32) -> i32 {
    %c0_i32 = arith.constant 0 : i32
    %c0_i32_0 = arith.constant 0 : i32
    return %c0_i32 : i32
  }
  func.func @transform_1(%arg0: i32) -> (i32, i32) {
    %c0_i32 = arith.constant 0 : i32
    %c0_i32_0 = arith.constant 0 : i32
    return %arg0, %c0_i32 : i32, i32
  }
  func.func @transform_2(%arg0: i32) -> (i32, i32, i32) {
    %c0_i32 = arith.constant 0 : i32
    %c0_i32_0 = arith.constant 0 : i32
    %c0_i32_1 = arith.constant 0 : i32
    return %c0_i32, %arg0, %c0_i32_0 : i32, i32, i32
  }
}

</mosaic_0001>

<bundles_post_ra>
// kernel: tpu_custom_call.1
= control target key start
LH: loop header
LB: loop body
LE: loop exit
PB: predicated region body
PF: predicated region fallthrough
CT: control target
= control target key end

     0   :  { %7 = vsyncpa [#allocation5], 0  ;;  %s289_s0 = inlined_call_operand.hbm [shape: f32[4], index: 0, kind: input, shape index: {}]   ;;  %s290_s1 = inlined_call_operand.hbm [shape: f32[16,128], index: 1, kind: input, shape index: {}]   ;;  %s291_s2 = inlined_call_operand.hbm [shape: f32[4,16,128], index: 2, kind: output, shape index: {}]  }
   0x1   :  { %8 = vsyncpa [#allocation3], 0 }
   0x2   :  { %9 = vsyncpa [#allocation4], 0  ;;  %s15_s11 = sshll.u32 %s289_s0, 4  ;;  %s23_s14 = sshll.u32 %s290_s1, 4  ;;  %s16_s11 = int_to_ptr.hbm [resolvable:$true] %s15_s11  ;;  %s24_s14 = int_to_ptr.hbm [resolvable:$true] %s23_s14 }
   0x3   :  { %s248_s15 = smov [#allocation2]   ;;  %s249_s16 = smov [#allocation6]  }
   0x4   :  { %18 = dma.hbm_to_smem %s16_s11, 16, %s248_s15, [#allocation5]  }
   0x5   :  { %s25_s17 = sshll.u32 %s249_s16, 4  ;;  %s250_s18 = smov 128   ;;  %s26_s17 = int_to_ptr.vmem [resolvable:$true] %s25_s17 }
   0x6   :  { %s251_s19 = smov 8  }
   0x7   :  { %31 = dma.hbm_to_vmem [thread:$0]  %s24_s14, 256, %s26_s17, [#allocation3], %s250_s18, %s250_s18, %s251_s19  }
   0x8   :  { %242 = dma.done.wait [#allocation5], 16  }
   0x9   :  { %243 = vsyncadd [#allocation5], 4294967280 }
   0xa   :  { %244 = dma.done.wait [#allocation3], 256  }
   0xb   :  { %245 = vsyncadd [#allocation3], 4294967040 }
   0xc   :  { %40 = sfence }
   0xd   :  { %v41_v0 = vld [vmem:[#allocation6] sm:$0xff]  ;;  %v42_v1 = vld [vmem:[#allocation6 + $0x8] sm:$0xff]  ;;  %s277_s0 = sld [smem:[#allocation2]]  ;;  %s252_s22 = smov [#allocation7]  }
   0xe   :  { %162 = vrsqrt.f32 %v41_v0  ;;  %s154_s1 = sld [smem:[#allocation2 + $0x1]]  ;;  %vm50_vm0 = vcmp.eq.f32.partialorder %v41_v0, inf  ;;  %vm52_vm1 = vcmp.eq.f32.partialorder %v41_v0, 0.0  ;;  %v53_v13 = vand.u32 2147483648, %v41_v0  ;;  %s138_s23 = sshll.u32 %s252_s22, 4  ;;  %s139_s23 = int_to_ptr.vmem [resolvable:$true] %s138_s23 }
   0xf   :  { %164 = vrsqrt.f32 %v42_v1  ;;  %s155_s20 = sld [smem:[#allocation2 + $0x2]]  ;;  %vm62_vm2 = vcmp.eq.f32.partialorder %v42_v1, inf  ;;  %vm64_vm3 = vcmp.eq.f32.partialorder %v42_v1, 0.0  ;;  %v65_v16 = vand.u32 2147483648, %v42_v1  ;;  %s140_s26 = sshll.u32 %s291_s2, 4  ;;  %s141_s26 = int_to_ptr.hbm [resolvable:$true] %s140_s26 }
  0x10   :  { %s279_s21 = sld [smem:[#allocation2 + $0x3]] }
  0x13   :  { %v68_v17 = vstv %s277_s0 }
  0x14   :  { %v163_v2 = vpop.eup %162  ;;  %v84_v19 = vstv %s154_s1 }
  0x15   :  { %v165_v3 = vpop.eup %164  ;;  %v44_v4 = vmul.f32 %v163_v2, %v41_v0  ;;  %v101_v20 = vstv %s155_s20 }
  0x16   :  { %v56_v5 = vmul.f32 %v165_v3, %v42_v1  ;;  %v118_v24 = vstv %s279_s21 }
  0x17   :  { %v45_v6 = vmul.f32 %v163_v2, %v44_v4 }
  0x18   :  { %v57_v7 = vmul.f32 %v165_v3, %v56_v5 }
  0x19   :  { %v46_v8 = vmul.f32 0.5, %v45_v6 }
  0x1a   :  { %v58_v9 = vmul.f32 0.5, %v57_v7 }
  0x1b   :  { %v47_v10 = vsub.f32 1.5, %v46_v8 }
  0x1c   :  { %v59_v11 = vsub.f32 1.5, %v58_v9 }
  0x1d   :  { %v48_v12 = vmul.f32 %v163_v2, %v47_v10 }
  0x1e   :  { %v60_v14 = vmul.f32 %v165_v3, %v59_v11 }
  0x1f   :  { %v49_v15 = vmul.f32 %v48_v12, %v41_v0 }
  0x20   :  { %v61_v18 = vmul.f32 %v60_v14, %v42_v1 }
  0x21   :  { %v51_v21 = vsel %vm50_vm0, %v41_v0, %v49_v15 }
  0x22   :  { %v54_v22 = vsel %vm52_vm1, %v53_v13, %v51_v21  ;;  %v63_v23 = vsel %vm62_vm2, %v42_v1, %v61_v18 }
  0x23   :  { %v69_v25 = vmul.f32 %v68_v17, %v54_v22  ;;  %v66_v26 = vsel %vm64_vm3, %v65_v16, %v63_v23  ;;  %v85_v27 = vmul.f32 %v84_v19, %v54_v22  ;;  %v102_v28 = vmul.f32 %v101_v20, %v54_v22 }
  0x24   :  { %v70_v29 = vmul.f32 %v68_v17, %v66_v26  ;;  %v86_v30 = vmul.f32 %v84_v19, %v66_v26  ;;  %v103_v31 = vmul.f32 %v101_v20, %v66_v26  ;;  %v119_v34 = vmul.f32 %v118_v24, %v54_v22 }
  0x25   :  { %v73_v32 = vsub.f32 0.0, %v69_v25  ;;  %v89_v33 = vsub.f32 0.0, %v85_v27  ;;  %v106_v39 = vsub.f32 0.0, %v102_v28  ;;  %v120_v46 = vmul.f32 %v118_v24, %v66_v26 }
  0x26   :  { %v74_v35 = vsub.f32 0.0, %v70_v29  ;;  %v90_v36 = vsub.f32 0.0, %v86_v30  ;;  %v107_v42 = vsub.f32 0.0, %v103_v31  ;;  %v123_v44 = vsub.f32 0.0, %v119_v34 }
  0x27   :  { %v75_v37 = vmul.f32 1.442695, %v73_v32  ;;  %v91_v38 = vmul.f32 1.442695, %v89_v33  ;;  %v108_v43 = vmul.f32 1.442695, %v106_v39 }
  0x28   :  { %v77_v40 = vmul.f32 1.442695, %v74_v35  ;;  %v93_v41 = vmul.f32 1.442695, %v90_v36  ;;  %v110_v45 = vmul.f32 1.442695, %v107_v42 }
  0x29   :  { %166 = vpow2.f32 %v75_v37  ;;  %v125_v47 = vmul.f32 1.442695, %v123_v44  ;;  %v71_v48 = vadd.f32 1.0, %v69_v25  ;;  %v124_v49 = vsub.f32 0.0, %v120_v46 }
  0x2a   :  { %168 = vpow2.f32 %v77_v40  ;;  %v72_v50 = vadd.f32 1.0, %v70_v29  ;;  %v87_v51 = vadd.f32 1.0, %v85_v27  ;;  %v88_v54 = vadd.f32 1.0, %v86_v30 }
  0x2b   :  { %170 = vpow2.f32 %v91_v38  ;;  %v127_v52 = vmul.f32 1.442695, %v124_v49  ;;  %v104_v57 = vadd.f32 1.0, %v102_v28  ;;  %v105_v60 = vadd.f32 1.0, %v103_v31 }
  0x2c   :  { %172 = vpow2.f32 %v93_v41  ;;  %v121_v63 = vadd.f32 1.0, %v119_v34  ;;  %v122_v2 = vadd.f32 1.0, %v120_v46 }
  0x2d   :  { %174 = vpow2.f32 %v108_v43 }
  0x2e   :  { %176 = vpow2.f32 %v110_v45 }
  0x2f   :  { %v167_v53 = vpop.eup %166  ;;  %178 = vpow2.f32 %v125_v47 }
  0x30   :  { %v169_v55 = vpop.eup %168  ;;  %v79_v56 = vmul.f32 %v167_v53, %v71_v48  ;;  %180 = vpow2.f32 %v127_v52 }
  0x31   :  { %v171_v58 = vpop.eup %170  ;;  %v80_v59 = vmul.f32 %v169_v55, %v72_v50 }
  0x32   :  { %v173_v61 = vpop.eup %172  ;;  %81 = vst [vmem:[#allocation7] sm:$0xff] %v79_v56  ;;  %v95_v62 = vmul.f32 %v171_v58, %v87_v51 }
  0x33   :  { %v175_v0 = vpop.eup %174  ;;  %82 = vst [vmem:[#allocation7 + $0x8] sm:$0xff] %v80_v59  ;;  %v96_v1 = vmul.f32 %v173_v61, %v88_v54 }
  0x34   :  { %v177_v3 = vpop.eup %176  ;;  %98 = vst [vmem:[#allocation7 + $0x10] sm:$0xff] %v95_v62  ;;  %v112_v4 = vmul.f32 %v175_v0, %v104_v57 }
  0x35   :  { %v179_v5 = vpop.eup %178  ;;  %99 = vst [vmem:[#allocation7 + $0x18] sm:$0xff] %v96_v1  ;;  %v113_v6 = vmul.f32 %v177_v3, %v105_v60 }
  0x36   :  { %v181_v7 = vpop.eup %180  ;;  %115 = vst [vmem:[#allocation7 + $0x20] sm:$0xff] %v112_v4  ;;  %v129_v8 = vmul.f32 %v179_v5, %v121_v63 }
  0x37   :  { %116 = vst [vmem:[#allocation7 + $0x28] sm:$0xff] %v113_v6  ;;  %v130_v9 = vmul.f32 %v181_v7, %v122_v2 }
  0x38   :  { %132 = vst [vmem:[#allocation7 + $0x30] sm:$0xff] %v129_v8 }
  0x39   :  { %133 = vst [vmem:[#allocation7 + $0x38] sm:$0xff] %v130_v9 }
  0x3a   :  { %146 = dma.vmem_to_hbm [thread:$0]  %s139_s23, 1024, %s141_s26, [#allocation4], %s250_s18, %s250_s18, %s251_s19  }
  0x3b   :  { %246 = dma.done.wait [#allocation4], 1024  }
  0x3c   :  { %247 = vsyncadd [#allocation4], 4294966272 }
  0x3d   :  { %151 = vsyncpa [#allocation3], 1 }
  0x3e   :  { %152 = vsyncpa [#allocation4], 1 }
  0x3f   :  { %153 = vsyncpa [#allocation5], 1 }

</bundles_post_ra>
